<compile_context>
chip_gen: v5e
topology: v5e:2x2
jax: 0.10.0
libtpu: 0.0.40
codegen_flags: <defaults>
</compile_context>

<pallas_src>
import functools

import jax
import jax.numpy as jnp
from jax.experimental import pallas as pl
from jax.experimental.pallas import tpu as pltpu

_LANES = 128
_SUBLANES = 8
_CHUNK_ROWS = 512          # in-kernel reduction chunk (rows of 128 lanes)


def _tversky_sums_kernel(p_ref, t_ref, pt_ref, sp_ref, st_ref, *,
                         block_rows, chunk_rows, n_full_chunks, rem_rows,
                         d_lanes, blocks_per_core, needs_mask, has_core_axis):
    """Accumulate per-sample, lane-wise partial sums of p*t, p and t."""
    if has_core_axis:
        c = pl.program_id(0)
        i = pl.program_id(1)
        blk = c * blocks_per_core + i        # unclamped global block index
    else:
        i = pl.program_id(0)
        blk = i

    @pl.when(i == 0)
    def _init():
        pt_ref[...] = jnp.zeros_like(pt_ref)
        sp_ref[...] = jnp.zeros_like(sp_ref)
        st_ref[...] = jnp.zeros_like(st_ref)

    def step(start, rows, masked):
        p = p_ref[:, pl.ds(start, rows), :].astype(jnp.float32)
        t = t_ref[:, pl.ds(start, rows), :].astype(jnp.float32)
        if masked:
            # Row index along the reduction axis; rows past d_lanes are
            # out-of-range garbage and must be selected away (select, NOT a
            # multiply -- garbage may be NaN/Inf).
            ridx = (blk * block_rows + start
                    + jax.lax.broadcasted_iota(jnp.int32, (rows, _LANES), 0))
            valid = ridx < d_lanes
            p = jnp.where(valid, p, 0.0)
            t = jnp.where(valid, t, 0.0)
        pt_ref[...] += jnp.sum(p * t, axis=1)
        sp_ref[...] += jnp.sum(p, axis=1)
        st_ref[...] += jnp.sum(t, axis=1)

    def accumulate(masked):
        # Chunk the in-block reduction so f32 temporaries (cast p, cast t,
        # p*t) stay bounded to a few chunks regardless of block size.
        if n_full_chunks == 1 and rem_rows == 0:
            step(0, chunk_rows, masked)
        else:
            def body(ci, carry):
                step(pl.multiple_of(ci * chunk_rows, chunk_rows),
                     chunk_rows, masked)
                return carry
            jax.lax.fori_loop(0, n_full_chunks, body, 0, unroll=True)
            if rem_rows:
                step(n_full_chunks * chunk_rows, rem_rows, masked)

    if needs_mask:
        # Gate the mask: fully-in-range blocks pay zero extra VALU work; only
        # the ragged tail block (and any clamped redundant block on the
        # second core) takes the masked path.
        is_full = (blk + 1) * block_rows <= d_lanes

        @pl.when(is_full)
        def _full():
            accumulate(False)

        @pl.when(jnp.logical_not(is_full))
        def _ragged():
            accumulate(True)
    else:
        accumulate(False)


def _tversky_sums_kernel_2d(p_ref, t_ref, pt_ref, sp_ref, st_ref, *,
                            block_cols, d, needs_mask):
    """Fallback for D % 128 != 0: 2-D (N, D) column blocks, lane-tail mask."""
    j = pl.program_id(0)

    @pl.when(j == 0)
    def _init():
        pt_ref[...] = jnp.zeros_like(pt_ref)
        sp_ref[...] = jnp.zeros_like(sp_ref)
        st_ref[...] = jnp.zeros_like(st_ref)

    def accumulate(masked):
        p = p_ref[...].astype(jnp.float32)
        t = t_ref[...].astype(jnp.float32)
        if masked:
            cols = j * block_cols + jax.lax.broadcasted_iota(
                jnp.int32, p.shape, 1)
            valid = cols < d
            p = jnp.where(valid, p, 0.0)
            t = jnp.where(valid, t, 0.0)
        pt_ref[...] += jnp.sum(p * t, axis=1, keepdims=True)
        sp_ref[...] += jnp.sum(p, axis=1, keepdims=True)
        st_ref[...] += jnp.sum(t, axis=1, keepdims=True)

    if needs_mask:
        is_full = (j + 1) * block_cols <= d

        @pl.when(is_full)
        def _full():
            accumulate(False)

        @pl.when(jnp.logical_not(is_full))
        def _ragged():
            accumulate(True)
    else:
        accumulate(False)


def _chip_defaults():
    """Generation-aware block / VMEM / core defaults."""
    kind = ""
    try:
        kind = jax.devices()[0].device_kind.lower()
    except Exception:
        pass
    if "v7" in kind:
        # v7x: 2 TensorCores per chip, only 64 MiB VMEM per core.
        return dict(num_cores=2, vmem_limit_bytes=48 << 20,
                    target_block_bytes=4 << 20, max_block_bytes=6 << 20)
    # v5e / v6e (and other single-TC generations): 128 MiB VMEM, 1 TC.
    return dict(num_cores=1, vmem_limit_bytes=64 << 20,
                target_block_bytes=4 << 20, max_block_bytes=8 << 20)


def _pick_block_rows(n, d_lanes, size_itemsize, align, target_bytes, max_bytes):
    """Rows of 128 lanes per grid step, aiming for ~target bytes per input."""
    row_bytes = n * _LANES * size_itemsize
    want = max(1, target_bytes // row_bytes)
    cap = max(1, max_bytes // row_bytes)
    r = int(min(want, cap))
    if r >= d_lanes:
        return int(d_lanes)                       # one block, full axis
    if r >= _CHUNK_ROWS:
        r = (r // _CHUNK_ROWS) * _CHUNK_ROWS      # clean chunking
    else:
        r = max(align, (r // align) * align)
    return int(min(r, d_lanes))


def tversky_loss(predict, target, *, alpha=0.5, beta=0.5, gamma=1.0, eps=1e-6,
                 reduction="mean", block_rows=None, num_cores=None,
                 target_block_bytes=None, max_block_bytes=None,
                 vmem_limit_bytes=None):
    """Pallas TPU implementation of TverskyLoss.forward."""
    cfg = _chip_defaults()
    if num_cores is None:
        num_cores = cfg["num_cores"]
    if target_block_bytes is None:
        target_block_bytes = cfg["target_block_bytes"]
    if max_block_bytes is None:
        max_block_bytes = cfg["max_block_bytes"]
    if vmem_limit_bytes is None:
        vmem_limit_bytes = cfg["vmem_limit_bytes"]

    n = predict.shape[0]
    p2 = predict.reshape(n, -1)
    t2 = target.reshape(n, -1)
    if p2.shape != t2.shape:
        raise ValueError("predict and target must flatten to the same size")
    d = p2.shape[1]

    # Non-float inputs (rare for this loss) are cast up front.
    if not jnp.issubdtype(p2.dtype, jnp.floating):
        p2 = p2.astype(jnp.float32)
    if not jnp.issubdtype(t2.dtype, jnp.floating):
        t2 = t2.astype(jnp.float32)

    size_itemsize = max(jnp.dtype(p2.dtype).itemsize,
                        jnp.dtype(t2.dtype).itemsize)
    min_itemsize = min(jnp.dtype(p2.dtype).itemsize,
                       jnp.dtype(t2.dtype).itemsize)
    align = _SUBLANES * max(1, 4 // min_itemsize)   # 8 f32, 16 bf16, 32 i8

    arb = getattr(pltpu, "ARBITRARY", "arbitrary")
    core_par = getattr(pltpu, "CORE_PARALLEL", "parallel")

    if d % _LANES == 0:
        # -------- fast path: lane-dense (N, d_lanes, 128) streaming --------
        d_lanes = d // _LANES
        p3 = p2.reshape(n, d_lanes, _LANES)     # row-major reshape: free
        t3 = t2.reshape(n, d_lanes, _LANES)

        if block_rows is None:
            block_rows = _pick_block_rows(n, d_lanes, size_itemsize, align,
                                          target_block_bytes, max_block_bytes)
        block_rows = int(block_rows)
        if block_rows >= d_lanes:
            block_rows = d_lanes                   # full reduction axis
        else:
            block_rows = max(align, (block_rows // align) * align)
            block_rows = min(block_rows, d_lanes)

        chunk_rows = min(_CHUNK_ROWS, block_rows)
        n_full_chunks = block_rows // chunk_rows
        rem_rows = block_rows - n_full_chunks * chunk_rows

        d_blocks = pl.cdiv(d_lanes, block_rows)
        nc = int(num_cores) if (int(num_cores) > 1 and d_blocks >= 2) else 1
        blocks_per_core = pl.cdiv(d_blocks, nc)
        needs_mask = (blocks_per_core * nc != d_blocks) or \
                     (d_blocks * block_rows != d_lanes)

        kernel = functools.partial(
            _tversky_sums_kernel,
            block_rows=int(block_rows),
            chunk_rows=int(chunk_rows),
            n_full_chunks=int(n_full_chunks),
            rem_rows=int(rem_rows),
            d_lanes=int(d_lanes),
            blocks_per_core=int(blocks_per_core),
            needs_mask=bool(needs_mask),
            has_core_axis=(nc > 1),
        )

        if nc == 1:
            # Single-TC chips: plain 1-D reduction grid, no redundant blocks.
            grid = (int(d_blocks),)
            in_specs = [pl.BlockSpec((n, block_rows, _LANES),
                                     lambda i: (0, i, 0))] * 2
            out_specs = [pl.BlockSpec((n, _LANES), lambda i: (0, 0))] * 3
            out_shape = tuple(jax.ShapeDtypeStruct((n, _LANES), jnp.float32)
                              for _ in range(3))
            dims = (arb,)
        else:
            # v7x: real 2-core split of the reduction blocks.
            def in_map(c, i):
                blk = jnp.minimum(c * blocks_per_core + i, d_blocks - 1)
                return (0, blk, 0)
            grid = (nc, int(blocks_per_core))
            in_specs = [pl.BlockSpec((n, block_rows, _LANES), in_map)] * 2
            out_specs = [pl.BlockSpec((None, n, _LANES),
                                      lambda c, i: (c, 0, 0))] * 3
            out_shape = tuple(jax.ShapeDtypeStruct((nc, n, _LANES),
                                                   jnp.float32)
                              for _ in range(3))
            dims = (core_par, arb)

        pt_sums, p_sums, t_sums = pl.pallas_call(
            kernel,
            out_shape=out_shape,
            grid_spec=pltpu.PrefetchScalarGridSpec(
                num_scalar_prefetch=0, grid=grid,
                in_specs=in_specs, out_specs=list(out_specs)),
            compiler_params=pltpu.CompilerParams(
                dimension_semantics=dims,
                vmem_limit_bytes=int(vmem_limit_bytes)),
        )(p3, t3)

        if nc == 1:
            inter = jnp.sum(pt_sums, axis=-1)
            sum_p = jnp.sum(p_sums, axis=-1)
            sum_t = jnp.sum(t_sums, axis=-1)
        else:
            inter = jnp.sum(pt_sums, axis=(0, 2))
            sum_p = jnp.sum(p_sums, axis=(0, 2))
            sum_t = jnp.sum(t_sums, axis=(0, 2))
    else:
        # ---- ragged-lane path: 2-D (N, D), in-kernel lane-tail mask -------
        # (replaces the old jnp.pad fallback; no extra HBM pass)
        if d < _LANES:
            block_cols = d                         # single full-extent block
        else:
            small_target = min(int(target_block_bytes), 2 << 20)
            row_bytes = n * size_itemsize
            want = max(_LANES, (small_target // row_bytes) // _LANES * _LANES)
            block_cols = min(int(want), (d // _LANES) * _LANES)
        n_col_blocks = pl.cdiv(d, block_cols)
        needs_mask = (n_col_blocks * block_cols != d)

        kernel = functools.partial(
            _tversky_sums_kernel_2d,
            block_cols=int(block_cols), d=int(d), needs_mask=bool(needs_mask))

        out_shape = tuple(jax.ShapeDtypeStruct((n, 1), jnp.float32)
                          for _ in range(3))
        pt_sums, p_sums, t_sums = pl.pallas_call(
            kernel,
            out_shape=out_shape,
            grid_spec=pltpu.PrefetchScalarGridSpec(
                num_scalar_prefetch=0, grid=(int(n_col_blocks),),
                in_specs=[pl.BlockSpec((n, block_cols),
                                       lambda j: (0, j))] * 2,
                out_specs=[pl.BlockSpec((n, 1), lambda j: (0, 0))] * 3),
            compiler_params=pltpu.CompilerParams(
                dimension_semantics=(arb,),
                vmem_limit_bytes=int(vmem_limit_bytes)),
        )(p2, t2)
        inter = pt_sums[:, 0]
        sum_p = p_sums[:, 0]
        sum_t = t_sums[:, 0]

    # Tiny finalize in plain JAX: Tversky formula + reduction.
    fps = sum_p - inter
    fns = sum_t - inter
    tversky = (inter + eps) / (inter + alpha * fps + beta * fns + eps)
    loss = 1.0 - tversky
    if gamma != 1.0:
        loss = loss ** gamma
    if reduction == "mean":
        return jnp.mean(loss)
    if reduction == "sum":
        return jnp.sum(loss)
    if reduction == "none":
        return loss
    raise ValueError(f"Unexpected reduction {reduction}")


def _reference(predict, target, alpha=0.5, beta=0.5, gamma=1.0, eps=1e-6):
    n = predict.shape[0]
    p = predict.reshape(n, -1).astype(jnp.float32)
    t = target.reshape(n, -1).astype(jnp.float32)
    inter = jnp.sum(p * t, axis=1)
    fps = jnp.sum(p * (1.0 - t), axis=1)
    fns = jnp.sum((1.0 - p) * t, axis=1)
    tv = (inter + eps) / (inter + alpha * fps + beta * fns + eps)
    return jnp.mean((1.0 - tv) ** gamma)


if __name__ == "__main__":
    key = jax.random.PRNGKey(0)
    k1, k2, k3, k4, k5, k6 = jax.random.split(key, 6)

    # Case 1: canonical small NCHW use (single-block fast path, f32).
    N, C, H, W = 2, 4, 16, 16
    predict = jax.nn.sigmoid(jax.random.normal(k1, (N, C, H, W), jnp.float32))
    target = (jax.random.uniform(k2, (N, C, H, W)) > 0.5).astype(jnp.float32)
    loss = tversky_loss(predict, target, alpha=0.5, beta=0.5, gamma=1.0)
    jax.block_until_ready(loss)
    ref = _reference(predict, target)
    assert jnp.allclose(loss, ref, rtol=1e-4, atol=1e-6), (loss, ref)

    # Case 2: bf16 inputs + forced small block -> multi-block reduction grid
    # with a gated ragged-tail mask (and the 2-core split when run on v7x).
    N2, C2, H2, W2 = 3, 4, 24, 100
    p_b = jax.nn.sigmoid(jax.random.normal(k3, (N2, C2, H2, W2), jnp.float32))
    p_b = p_b.astype(jnp.bfloat16)
    t_b = (jax.random.uniform(k4, (N2, C2, H2, W2)) > 0.5).astype(jnp.bfloat16)
    loss2 = tversky_loss(p_b, t_b, alpha=0.7, beta=0.3, gamma=1.0,
                         block_rows=16)
    jax.block_until_ready(loss2)
    ref2 = _reference(p_b, t_b, alpha=0.7, beta=0.3, gamma=1.0)
    assert jnp.allclose(loss2, ref2, rtol=1e-3, atol=1e-5), (loss2, ref2)

    # Case 3: feature size not a multiple of 128 -> pad-free 2-D ragged-lane
    # path (in-kernel lane mask, two column blocks).
    N3, C3, H3, W3 = 2, 3, 10, 11
    p_c = jax.nn.sigmoid(jax.random.normal(k5, (N3, C3, H3, W3), jnp.float32))
    t_c = (jax.random.uniform(k6, (N3, C3, H3, W3)) > 0.5).astype(jnp.float32)
    loss3 = tversky_loss(p_c, t_c)
    jax.block_until_ready(loss3)
    ref3 = _reference(p_c, t_c)
    assert jnp.allclose(loss3, ref3, rtol=1e-4, atol=1e-6), (loss3, ref3)

    print("KERNEL_OK")
</pallas_src>

<mosaic_0001>
module attributes {stable_mosaic.version = 11 : i64} {
  func.func @_tversky_sums_kernel(%arg0: i32, %arg1: memref<2x8x128xf32, #tpu.memory_space<vmem>>, %arg2: memref<2x8x128xf32, #tpu.memory_space<vmem>>, %arg3: memref<2x128xf32, #tpu.memory_space<vmem>>, %arg4: memref<2x128xf32, #tpu.memory_space<vmem>>, %arg5: memref<2x128xf32, #tpu.memory_space<vmem>>) attributes {dimension_semantics = [#tpu.dimension_semantics<arbitrary>], iteration_bounds = array<i64: 1>, scalar_prefetch = 0 : i64, scratch_operands = 0 : i64, tpu.core_type = #tpu.core_type<tc>, window_params = [{transform_indices = @transform_0, window_bounds = array<i64: 2, 8, 128>}, {transform_indices = @transform_1, window_bounds = array<i64: 2, 8, 128>}, {pipeline_mode = #tpu.pipeline_mode<synchronous>, transform_indices = @transform_2, window_bounds = array<i64: 2, 128>}, {pipeline_mode = #tpu.pipeline_mode<synchronous>, transform_indices = @transform_3, window_bounds = array<i64: 2, 128>}, {pipeline_mode = #tpu.pipeline_mode<synchronous>, transform_indices = @transform_4, window_bounds = array<i64: 2, 128>}]} {
    %c0_i32 = arith.constant 0 : i32
    %0 = arith.cmpi eq, %arg0, %c0_i32 : i32
    %1 = arith.extui %0 : i1 to i32
    %c0_i32_0 = arith.constant 0 : i32
    %2 = arith.cmpi ne, %1, %c0_i32_0 : i32
    scf.if %2 {
      %cst_20 = arith.constant 0.000000e+00 : f32
      %18 = vector.broadcast %cst_20 : f32 to vector<2x128xf32>
      %c0_21 = arith.constant 0 : index
      %c0_22 = arith.constant 0 : index
      %19 = vector.load %arg3[%c0_21, %c0_22] : memref<2x128xf32, #tpu.memory_space<vmem>>, vector<2x128xf32>
      tpu.vector_store %arg3[%c0_21, %c0_22], %18 {strides = array<i32>} : memref<2x128xf32, #tpu.memory_space<vmem>>, vector<2x128xf32>,
      %cst_23 = arith.constant 0.000000e+00 : f32
      %20 = vector.broadcast %cst_23 : f32 to vector<2x128xf32>
      %c0_24 = arith.constant 0 : index
      %c0_25 = arith.constant 0 : index
      %21 = vector.load %arg4[%c0_24, %c0_25] : memref<2x128xf32, #tpu.memory_space<vmem>>, vector<2x128xf32>
      tpu.vector_store %arg4[%c0_24, %c0_25], %20 {strides = array<i32>} : memref<2x128xf32, #tpu.memory_space<vmem>>, vector<2x128xf32>,
      %cst_26 = arith.constant 0.000000e+00 : f32
      %22 = vector.broadcast %cst_26 : f32 to vector<2x128xf32>
      %c0_27 = arith.constant 0 : index
      %c0_28 = arith.constant 0 : index
      %23 = vector.load %arg5[%c0_27, %c0_28] : memref<2x128xf32, #tpu.memory_space<vmem>>, vector<2x128xf32>
      tpu.vector_store %arg5[%c0_27, %c0_28], %22 {strides = array<i32>} : memref<2x128xf32, #tpu.memory_space<vmem>>, vector<2x128xf32>,
    } else {
    }
    %c0 = arith.constant 0 : index
    %c0_1 = arith.constant 0 : index
    %c0_2 = arith.constant 0 : index
    %3 = vector.load %arg1[%c0, %c0_1, %c0_2] : memref<2x8x128xf32, #tpu.memory_space<vmem>>, vector<2x8x128xf32>
    %c0_3 = arith.constant 0 : index
    %c0_4 = arith.constant 0 : index
    %c0_5 = arith.constant 0 : index
    %4 = vector.load %arg2[%c0_3, %c0_4, %c0_5] : memref<2x8x128xf32, #tpu.memory_space<vmem>>, vector<2x8x128xf32>
    %c0_6 = arith.constant 0 : index
    %c0_7 = arith.constant 0 : index
    %5 = vector.load %arg3[%c0_6, %c0_7] : memref<2x128xf32, #tpu.memory_space<vmem>>, vector<2x128xf32>
    %6 = arith.mulf %3, %4 : vector<2x8x128xf32>
    %cst = arith.constant dense<0.000000e+00> : vector<2x128xf32>
    %7 = vector.multi_reduction <add>, %6, %cst [1] : vector<2x8x128xf32> to vector<2x128xf32>
    %8 = arith.addf %5, %7 : vector<2x128xf32>
    %c0_8 = arith.constant 0 : index
    %c0_9 = arith.constant 0 : index
    %9 = vector.load %arg3[%c0_8, %c0_9] : memref<2x128xf32, #tpu.memory_space<vmem>>, vector<2x128xf32>
    tpu.vector_store %arg3[%c0_8, %c0_9], %8 {strides = array<i32>} : memref<2x128xf32, #tpu.memory_space<vmem>>, vector<2x128xf32>,
    %c0_10 = arith.constant 0 : index
    %c0_11 = arith.constant 0 : index
    %10 = vector.load %arg4[%c0_10, %c0_11] : memref<2x128xf32, #tpu.memory_space<vmem>>, vector<2x128xf32>
    %cst_12 = arith.constant dense<0.000000e+00> : vector<2x128xf32>
    %11 = vector.multi_reduction <add>, %3, %cst_12 [1] : vector<2x8x128xf32> to vector<2x128xf32>
    %12 = arith.addf %10, %11 : vector<2x128xf32>
    %c0_13 = arith.constant 0 : index
    %c0_14 = arith.constant 0 : index
    %13 = vector.load %arg4[%c0_13, %c0_14] : memref<2x128xf32, #tpu.memory_space<vmem>>, vector<2x128xf32>
    tpu.vector_store %arg4[%c0_13, %c0_14], %12 {strides = array<i32>} : memref<2x128xf32, #tpu.memory_space<vmem>>, vector<2x128xf32>,
    %c0_15 = arith.constant 0 : index
    %c0_16 = arith.constant 0 : index
    %14 = vector.load %arg5[%c0_15, %c0_16] : memref<2x128xf32, #tpu.memory_space<vmem>>, vector<2x128xf32>
    %cst_17 = arith.constant dense<0.000000e+00> : vector<2x128xf32>
    %15 = vector.multi_reduction <add>, %4, %cst_17 [1] : vector<2x8x128xf32> to vector<2x128xf32>
    %16 = arith.addf %14, %15 : vector<2x128xf32>
    %c0_18 = arith.constant 0 : index
    %c0_19 = arith.constant 0 : index
    %17 = vector.load %arg5[%c0_18, %c0_19] : memref<2x128xf32, #tpu.memory_space<vmem>>, vector<2x128xf32>
    tpu.vector_store %arg5[%c0_18, %c0_19], %16 {strides = array<i32>} : memref<2x128xf32, #tpu.memory_space<vmem>>, vector<2x128xf32>,
    return
  }
  func.func @transform_0(%arg0: i32) -> (i32, i32, i32) {
    %c0_i32 = arith.constant 0 : i32
    %c0_i32_0 = arith.constant 0 : i32
    %c0_i32_1 = arith.constant 0 : i32
    return %c0_i32, %arg0, %c0_i32_0 : i32, i32, i32
  }
  func.func @transform_1(%arg0: i32) -> (i32, i32, i32) {
    %c0_i32 = arith.constant 0 : i32
    %c0_i32_0 = arith.constant 0 : i32
    %c0_i32_1 = arith.constant 0 : i32
    return %c0_i32, %arg0, %c0_i32_0 : i32, i32, i32
  }
  func.func @transform_2(%arg0: i32) -> (i32, i32) {
    %c0_i32 = arith.constant 0 : i32
    %c0_i32_0 = arith.constant 0 : i32
    %c0_i32_1 = arith.constant 0 : i32
    return %c0_i32, %c0_i32_0 : i32, i32
  }
  func.func @transform_3(%arg0: i32) -> (i32, i32) {
    %c0_i32 = arith.constant 0 : i32
    %c0_i32_0 = arith.constant 0 : i32
    %c0_i32_1 = arith.constant 0 : i32
    return %c0_i32, %c0_i32_0 : i32, i32
  }
  func.func @transform_4(%arg0: i32) -> (i32, i32) {
    %c0_i32 = arith.constant 0 : i32
    %c0_i32_0 = arith.constant 0 : i32
    %c0_i32_1 = arith.constant 0 : i32
    return %c0_i32, %c0_i32_0 : i32, i32
  }
}

</mosaic_0001>

<bundles_post_ra>
// kernel: tpu_custom_call.1
= control target key start
LH: loop header
LB: loop body
LE: loop exit
PB: predicated region body
PF: predicated region fallthrough
CT: control target
= control target key end

     0   :  { %10 = vsyncpa [#allocation3], 0  ;;  %s358_s0 = inlined_call_operand.hbm [shape: f32[2,8,128], index: 0, kind: input, shape index: {}]   ;;  %s359_s1 = inlined_call_operand.hbm [shape: f32[2,8,128], index: 1, kind: input, shape index: {}]   ;;  %s360_s2 = inlined_call_operand.hbm [shape: f32[2,128], index: 2, kind: output, shape index: {0}]   ;;  %s361_s3 = inlined_call_operand.hbm [shape: f32[2,128], index: 3, kind: output, shape index: {1}]   ;;  %s362_s4 = inlined_call_operand.hbm [shape: f32[2,128], index: 4, kind: output, shape index: {2}]  }
   0x1   :  { %11 = vsyncpa [#allocation6], 0 }
   0x2   :  { %12 = vsyncpa [#allocation4], 0 }
   0x3   :  { %13 = vsyncpa [#allocation9], 0  ;;  %s18_s17 = sshll.u32 %s358_s0, 4  ;;  %s304_s18 = smov [#allocation2]   ;;  %s19_s17 = int_to_ptr.hbm [resolvable:$true] %s18_s17 }
   0x4   :  { %s20_s19 = sshll.u32 %s304_s18, 4  ;;  %s31_s22 = sshll.u32 %s359_s1, 4  ;;  %s21_s19 = int_to_ptr.vmem [resolvable:$true] %s20_s19  ;;  %s32_s22 = int_to_ptr.hbm [resolvable:$true] %s31_s22 }
   0x5   :  { %s305_s23 = smov 128   ;;  %s306_s24 = smov 8  }
   0x6   :  { %26 = dma.hbm_to_vmem [thread:$0]  %s19_s17, 256, %s21_s19, [#allocation3], %s305_s23, %s305_s23, %s306_s24  }
   0x7   :  { %s307_s25 = smov [#allocation5]  }
   0x8   :  { %s33_s26 = sshll.u32 %s307_s25, 4  ;;  %s34_s26 = int_to_ptr.vmem [resolvable:$true] %s33_s26 }
   0x9   :  { %39 = dma.hbm_to_vmem [thread:$0]  %s32_s22, 256, %s34_s26, [#allocation6], %s305_s23, %s305_s23, %s306_s24  }
   0xa   :  { %296 = dma.done.wait [#allocation3], 256  }
   0xb   :  { %297 = vsyncadd [#allocation3], 4294967040 }
   0xc   :  { %298 = dma.done.wait [#allocation6], 256  }
   0xd   :  { %299 = vsyncadd [#allocation6], 4294967040  ;;  %v308_v0 = vmov 0.0   ;;  %v55_v1 = vld [vmem:[#allocation2] sm:$0xff]  ;;  %v56_v2 = vld [vmem:[#allocation2 + $0x8] sm:$0xff]  ;;  %vm76_vm0 = vcmask 1041409  }
   0xe   :  { %53 = vst [vmem:[#allocation8] sm:$0x3] %v308_v0  ;;  %v57_v3 = vld [vmem:[#allocation5] sm:$0xff]  ;;  %v82_v4 = vrot.slane %v55_v1, 4  ;;  %v88_v5 = vrot.slane %v56_v2, 4  ;;  %v58_v6 = vld [vmem:[#allocation5 + $0x8] sm:$0xff] }
   0xf   :  { %52 = vst [vmem:[#allocation7] sm:$0x3] %v308_v0  ;;  %v60_v7 = vmul.f32 %v57_v3, %v55_v1  ;;  %v101_v8 = vrot.slane %v57_v3, 4  ;;  %v61_v9 = vmul.f32 %v58_v6, %v56_v2  ;;  %v107_v10 = vrot.slane %v58_v6, 4  ;;  %s309_s0 = smov [#allocation8]   ;;  %s137_s29 = sshll.u32 %s361_s3, 4  ;;  %s138_s29 = int_to_ptr.hbm [resolvable:$true] %s137_s29 }
  0x10   :  { %54 = vst [vmem:[#allocation10] sm:$0x3] %v308_v0  ;;  %v83_v11 = vadd.f32 %v82_v4, %v55_v1  ;;  %v89_v12 = vadd.f32 %v88_v5, %v56_v2  ;;  %s343_s1 = sshll.u32 %s309_s0, 4  ;;  %s310_s30 = smov [#allocation10]   ;;  %s136_s1 = int_to_ptr.vmem [resolvable:$true] %s343_s1 }
  0x11   :  { %v62_v13 = vrot.slane %v60_v7, 4  ;;  %v102_v14 = vadd.f32 %v101_v8, %v57_v3  ;;  %v68_v15 = vrot.slane %v61_v9, 4  ;;  %v108_v16 = vadd.f32 %v107_v10, %v58_v6  ;;  %s146_s5 = sshll.u32 %s310_s30, 4  ;;  %s148_s8 = sshll.u32 %s362_s4, 4  ;;  %s147_s5 = int_to_ptr.vmem [resolvable:$true] %s146_s5  ;;  %s149_s8 = int_to_ptr.hbm [resolvable:$true] %s148_s8 }
  0x12   :  { %v84_v17 = vrot.slane %v83_v11, 2  ;;  %v90_v18 = vrot.slane %v89_v12, 2  ;;  %s311_s9 = smov [#allocation7]   ;;  %s126_s13 = sshll.u32 %s360_s2, 4  ;;  %s127_s13 = int_to_ptr.hbm [resolvable:$true] %s126_s13 }
  0x13   :  { %v63_v19 = vadd.f32 %v62_v13, %v60_v7  ;;  %v103_v20 = vrot.slane %v102_v14, 2  ;;  %v69_v21 = vadd.f32 %v68_v15, %v61_v9  ;;  %v109_v22 = vrot.slane %v108_v16, 2  ;;  %s124_s10 = sshll.u32 %s311_s9, 4  ;;  %s125_s10 = int_to_ptr.vmem [resolvable:$true] %s124_s10 }
  0x14   :  { %v85_v23 = vadd.f32 %v84_v17, %v83_v11  ;;  %v91_v24 = vadd.f32 %v90_v18, %v89_v12 }
  0x15   :  { %v64_v25 = vrot.slane %v63_v19, 2  ;;  %v104_v26 = vadd.f32 %v103_v20, %v102_v14  ;;  %v70_v27 = vrot.slane %v69_v21, 2  ;;  %v110_v28 = vadd.f32 %v109_v22, %v108_v16  ;;  %v81_v35 = vld [vmem:[#allocation8] sm:$0x3] }
  0x16   :  { %v86_v29 = vrot.slane %v85_v23, 1  ;;  %v92_v30 = vrot.slane %v91_v24, 1  ;;  %v59_v46 = vld [vmem:[#allocation7] sm:$0x3] }
  0x17   :  { %v65_v31 = vadd.f32 %v64_v25, %v63_v19  ;;  %v105_v32 = vrot.slane %v104_v26, 1  ;;  %v71_v33 = vadd.f32 %v70_v27, %v69_v21  ;;  %v111_v34 = vrot.slane %v110_v28, 1  ;;  %v100_v41 = vld [vmem:[#allocation10] sm:$0x3] }
  0x18   :  { %v87_v36 = vadd.f32 %v86_v29, %v85_v23  ;;  %v93_v37 = vadd.f32 %v92_v30, %v91_v24 }
  0x19   :  { %v66_v38 = vrot.slane %v65_v31, 1  ;;  %v106_v39 = vadd.f32 %v105_v32, %v104_v26  ;;  %v72_v40 = vrot.slane %v71_v33, 1  ;;  %v112_v42 = vadd.f32 %v111_v34, %v110_v28 }
  0x1a   :  { %v96_v43 = vsel %vm76_vm0, %v93_v37, %v87_v36 }
  0x1b   :  { %v67_v44 = vadd.f32 %v66_v38, %v65_v31  ;;  %v98_v45 = vadd.f32 %v96_v43, %v81_v35  ;;  %v73_v47 = vadd.f32 %v72_v40, %v71_v33  ;;  %v115_v48 = vsel %vm76_vm0, %v112_v42, %v106_v39 }
  0x1c   :  { %v117_v49 = vadd.f32 %v115_v48, %v100_v41 }
  0x1d   :  { %99 = vst [vmem:[#allocation8] sm:$0x3] %v98_v45  ;;  %v77_v50 = vsel %vm76_vm0, %v73_v47, %v67_v44 }
  0x1e   :  { %v79_v51 = vadd.f32 %v77_v50, %v59_v46  ;;  %118 = vst [vmem:[#allocation10] sm:$0x3] %v117_v49  ;;  %140 = dma.vmem_to_hbm [thread:$0]  %s136_s1, 32, %s138_s29, [#allocation9]  }
  0x1f   :  { %151 = dma.vmem_to_hbm [thread:$0]  %s147_s5, 32, %s149_s8, [#allocation9]  }
  0x20   :  { %80 = vst [vmem:[#allocation7] sm:$0x3] %v79_v51 }
  0x21   :  { %129 = dma.vmem_to_hbm [thread:$0]  %s125_s10, 32, %s127_s13, [#allocation4]  }
  0x22   :  { %300 = dma.done.wait [#allocation4], 32  }
  0x23   :  { %301 = vsyncadd [#allocation4], 4294967264 }
  0x24   :  { %302 = dma.done.wait [#allocation9], 64  }
  0x25   :  { %303 = vsyncadd [#allocation9], 4294967232 }
  0x26   :  { %164 = vsyncpa [#allocation3], 1 }
  0x27   :  { %165 = vsyncpa [#allocation6], 1 }
  0x28   :  { %166 = vsyncpa [#allocation4], 1 }
  0x29   :  { %167 = vsyncpa [#allocation9], 1 }

</bundles_post_ra>
